<compile_context>
chip_gen: v7x
topology: tpu7x:2x2x1
jax: 0.10.0
libtpu: 0.0.40
codegen_flags: <defaults>
</compile_context>

<pallas_src>
import functools

import jax
import jax.numpy as jnp
from jax.experimental import pallas as pl
from jax.experimental.pallas import tpu as pltpu


# ----------------------------------------------------------------------------
# Pallas kernel: conv (in-VMEM im2col + one big-K MXU matmul) + folded-BN bias
#                [+ identity residual | fused 1x1 downsample conv] [+ ReLU]
# ----------------------------------------------------------------------------
def _conv_bn_kernel(*refs, ksize, stride, row_tile, wo, cin, apply_relu,
                    has_residual, residual_conv):
    if has_residual and residual_conv:
        x_ref, w_ref, b_ref, res_ref, rw_ref, o_ref, xcol_ref = refs
    elif has_residual:
        x_ref, w_ref, b_ref, res_ref, o_ref, xcol_ref = refs
        rw_ref = None
    else:
        x_ref, w_ref, b_ref, o_ref, xcol_ref = refs
        res_ref = rw_ref = None

    # Output-row offset of this spatial tile.
    r0 = pl.multiple_of(pl.program_id(1) * row_tile, row_tile)

    # Assemble the im2col tile in VMEM: each (kh, kw) tap is a contiguous
    # slice of the resident phase-decomposed input, written into its own
    # column band of the scratch.  The f32 scratch keeps the
    # (row_tile, Wo, Cin) -> (row_tile*Wo, Cin) collapse in the native
    # (unpacked) sublane layout; MXU operands are cast at the dot.
    for kh in range(ksize):
        for kw in range(ksize):
            phase = (kh % stride) * stride + (kw % stride)
            tap = x_ref[0, phase,
                        pl.ds(r0 + kh // stride, row_tile),
                        pl.ds(kw // stride, wo), :]
            t = kh * ksize + kw
            xcol_ref[:, pl.ds(t * cin, cin)] = (
                tap.astype(jnp.float32).reshape(row_tile * wo, cin))

    # Single MXU matmul with K = k*k*Cin, f32 accumulation.
    y = jnp.dot(xcol_ref[...].astype(w_ref.dtype), w_ref[...],
                preferred_element_type=jnp.float32)
    y = y + b_ref[...].astype(jnp.float32)           # folded-BN bias

    if has_residual:
        r = res_ref[0]
        if residual_conv:
            # Fused 1x1 (stride-s) downsample conv; its BN scale is folded
            # into rw_ref and its BN bias into b_ref.
            y = y + jnp.dot(r, rw_ref[...], preferred_element_type=jnp.float32)
        else:
            y = y + r.astype(jnp.float32)             # identity residual
    if apply_relu:
        y = jnp.maximum(y, 0.0)
    o_ref[0] = y.astype(o_ref.dtype)                  # cast only at the store


# ----------------------------------------------------------------------------
# Wrapper: grid / BlockSpecs / scratch
# ----------------------------------------------------------------------------
def _nbytes(shape, dtype):
    n = 1
    for d in shape:
        n *= int(d)
    return n * jnp.dtype(dtype).itemsize


def _pick_row_tile(ho, wo, target=512):
    """Largest divisor t of `ho` whose flattened (t*wo, Cout) output tile stays
    around `target` rows (small per-tile accumulator, pipelined output DMA)
    while t*wo stays sublane-aligned (multiple of 8) or covers the image."""
    ok = [t for t in range(1, ho + 1)
          if ho % t == 0 and (t == ho or (t * wo) % 8 == 0)]
    small = [t for t in ok if t * wo <= target]
    return max(small) if small else min(ok)


def conv_bn_pallas(phases, w2d, bias, *, ksize, stride, ho, wo, cout,
                   residual=None, residual_w=None, apply_relu=True):
    """phases: (N, s*s, Hph, Wph, Cin) phase-decomposed padded input.
    w2d: (k*k*Cin, Cout) with BN scale folded.  bias: (Cout,) f32.
    residual: optional (N, Ho*Wo, Cres).  residual_w: optional (Cres, Cout)
    (fused 1x1 downsample, BN scale folded).  Returns (N, Ho*Wo, Cout)."""
    n, s2, hph, wph, cin = phases.shape
    assert s2 == stride * stride
    kkcin = ksize * ksize * cin
    assert w2d.shape == (kkcin, cout), (w2d.shape, kkcin, cout)
    out_dtype = phases.dtype

    row_tile = _pick_row_tile(ho, wo)
    tp = row_tile * wo
    grid = (n, ho // row_tile)

    has_res = residual is not None
    res_conv = residual_w is not None

    kernel = functools.partial(
        _conv_bn_kernel, ksize=ksize, stride=stride, row_tile=row_tile,
        wo=wo, cin=cin, apply_relu=apply_relu,
        has_residual=has_res, residual_conv=res_conv)

    in_specs = [
        # Whole (padded, phase-decomposed) image per batch element: the block
        # index depends only on the batch axis, so it stays resident in VMEM
        # across all row tiles of that image (no re-fetch, 1x HBM read).
        pl.BlockSpec((1, s2, hph, wph, cin), lambda b, i: (b, 0, 0, 0, 0)),
        pl.BlockSpec((kkcin, cout), lambda b, i: (0, 0)),
        pl.BlockSpec((1, cout), lambda b, i: (0, 0)),
    ]
    args = [phases, w2d, bias.reshape(1, cout)]
    if has_res:
        cres = residual.shape[-1]
        in_specs.append(pl.BlockSpec((1, tp, cres), lambda b, i: (b, i, 0)))
        args.append(residual)
        if res_conv:
            in_specs.append(pl.BlockSpec((cres, cout), lambda b, i: (0, 0)))
            args.append(residual_w)

    # Explicit scoped-VMEM budget (double-buffered HBM-backed blocks + scratch)
    # -- sized so it also fits v7x (64 MiB physical VMEM).
    est = (2 * _nbytes((1, s2, hph, wph, cin), phases.dtype)
           + 2 * _nbytes((kkcin, cout), w2d.dtype)
           + 2 * _nbytes((1, cout), bias.dtype)
           + 2 * _nbytes((1, tp, cout), out_dtype)
           + _nbytes((tp, kkcin), jnp.float32)
           + (2 << 20))
    if has_res:
        est += 2 * _nbytes((1, tp, residual.shape[-1]), residual.dtype)
        if res_conv:
            est += 2 * _nbytes(residual_w.shape, residual_w.dtype)
    vmem_limit = int(min(max(est, 32 << 20), 64 << 20))

    return pl.pallas_call(
        kernel,
        out_shape=jax.ShapeDtypeStruct((n, ho * wo, cout), out_dtype),
        grid=grid,
        in_specs=in_specs,
        out_specs=pl.BlockSpec((1, tp, cout), lambda b, i: (b, i, 0)),
        scratch_shapes=[pltpu.VMEM((tp, kkcin), jnp.float32)],
        compiler_params=pltpu.CompilerParams(
            dimension_semantics=("parallel", "parallel"),
            vmem_limit_bytes=vmem_limit),
    )(*args)


# ----------------------------------------------------------------------------
# Glue: phase decomposition (1x data, replaces 9x im2col), weight/BN folding
# ----------------------------------------------------------------------------
def _to_phases(x_nhwc, ksize, stride):
    """Pad and decompose into stride phases:
    (N,H,W,C) -> (N, s*s, ceil(Hp/s), ceil(Wp/s), C).  Tap (kh, kw) of the
    strided conv is a *contiguous* slice of phase (kh%s)*s + (kw%s) at offset
    (kh//s, kw//s) -- total bytes == padded input bytes (no 9x blowup)."""
    pad = ksize // 2
    xp = jnp.pad(x_nhwc, ((0, 0), (pad, pad), (pad, pad), (0, 0)))
    n, hp, wp, c = xp.shape
    ho = (hp - ksize) // stride + 1
    wo = (wp - ksize) // stride + 1
    s = stride
    hp2 = -(-hp // s) * s
    wp2 = -(-wp // s) * s
    if (hp2, wp2) != (hp, wp):
        xp = jnp.pad(xp, ((0, 0), (0, hp2 - hp), (0, wp2 - wp), (0, 0)))
    hph, wph = hp2 // s, wp2 // s
    ph = xp.reshape(n, hph, s, wph, s, c)
    ph = jnp.transpose(ph, (0, 2, 4, 1, 3, 5)).reshape(n, s * s, hph, wph, c)
    return ph, ho, wo


def _weight_to_2d(w_oihw):
    """(Cout, Cin, kh, kw) -> (kh*kw*Cin, Cout), matching the kernel's im2col
    column order (tap-major, channel-minor)."""
    cout, cin, kh, kw = w_oihw.shape
    return jnp.transpose(w_oihw, (2, 3, 1, 0)).reshape(kh * kw * cin, cout)


def fold_bn(gamma, beta, mean, var, eps=1e-5):
    scale = gamma / jnp.sqrt(var + eps)
    bias = beta - mean * scale
    return scale, bias


# ----------------------------------------------------------------------------
# BasicBlock
# ----------------------------------------------------------------------------
class BasicBlockPallas:
    expansion = 1

    def __init__(self, in_planes, planes, food, index, stride=1, key=None,
                 compute_dtype=jnp.float32):
        if key is None:
            key = jax.random.PRNGKey(0)
        mid = int(food[index])
        self.in_planes, self.planes, self.mid = in_planes, planes, mid
        self.stride = stride
        self.compute_dtype = compute_dtype
        self.has_downsample = (stride != 1) or (in_planes != self.expansion * planes)

        ks = jax.random.split(key, 8)

        def bn_params(k, c):
            k1, k2, k3, k4 = jax.random.split(k, 4)
            gamma = 1.0 + 0.1 * jax.random.normal(k1, (c,), jnp.float32)
            beta = 0.1 * jax.random.normal(k2, (c,), jnp.float32)
            mean = 0.1 * jax.random.normal(k3, (c,), jnp.float32)
            var = 0.5 + 0.5 * jax.random.uniform(k4, (c,), jnp.float32)
            return gamma, beta, mean, var

        # Raw parameters (f32, also used by the pure-JAX reference).
        self.w1 = 0.1 * jax.random.normal(ks[0], (mid, in_planes, 3, 3), jnp.float32)
        self.bn1 = bn_params(ks[1], mid)
        self.w2 = 0.1 * jax.random.normal(ks[2], (planes, mid, 3, 3), jnp.float32)
        self.bn2 = bn_params(ks[3], planes)
        if self.has_downsample:
            self.wd = 0.1 * jax.random.normal(ks[4], (planes, in_planes, 1, 1), jnp.float32)
            self.bnd = bn_params(ks[5], planes)

        # Kernel-friendly forms: BN scale folded into the weights (MXU dtype),
        # BN bias kept in f32 for the f32 epilogue.
        s1, b1 = fold_bn(*self.bn1)
        self.w1_2d = (_weight_to_2d(self.w1) * s1[None, :]).astype(compute_dtype)
        self.bias1 = b1
        s2, b2 = fold_bn(*self.bn2)
        self.w2_2d = (_weight_to_2d(self.w2) * s2[None, :]).astype(compute_dtype)
        if self.has_downsample:
            sd, bd = fold_bn(*self.bnd)
            self.wd_2d = (jnp.transpose(self.wd[:, :, 0, 0]) * sd[None, :]
                          ).astype(compute_dtype)
            self.bias2 = b2 + bd          # downsample-BN bias folded into conv2 bias
        else:
            self.wd_2d = None
            self.bias2 = b2

    def __call__(self, x_nchw):
        cd = self.compute_dtype
        x = jnp.transpose(x_nchw, (0, 2, 3, 1)).astype(cd)       # -> NHWC
        n, h, w, cin = x.shape

        # conv1 -> bn1 -> relu
        ph1, ho, wo = _to_phases(x, 3, self.stride)
        out1 = conv_bn_pallas(ph1, self.w1_2d, self.bias1, ksize=3,
                              stride=self.stride, ho=ho, wo=wo, cout=self.mid,
                              apply_relu=True)
        out1_img = out1.reshape(n, ho, wo, self.mid)

        # Residual source (the 1x1 downsample conv itself is fused into the
        # conv2 kernel; here we only select the strided pixels it reads).
        if self.has_downsample:
            res = x[:, ::self.stride, ::self.stride, :].reshape(n, ho * wo, cin)
            res_w = self.wd_2d
        else:
            res = x.reshape(n, h * w, cin)
            res_w = None

        # conv2 -> bn2 (+ downsample BN bias) -> += residual -> relu
        ph2, ho2, wo2 = _to_phases(out1_img, 3, 1)
        out2 = conv_bn_pallas(ph2, self.w2_2d, self.bias2, ksize=3, stride=1,
                              ho=ho2, wo=wo2, cout=self.planes,
                              residual=res, residual_w=res_w, apply_relu=True)
        out2 = out2.reshape(n, ho2, wo2, self.planes)
        return jnp.transpose(out2, (0, 3, 1, 2)).astype(x_nchw.dtype)  # -> NCHW


# ----------------------------------------------------------------------------
# Pure-JAX reference (for correctness check)
# ----------------------------------------------------------------------------
def _ref_conv(x, w, stride, pad):
    return jax.lax.conv_general_dilated(
        x, w, (stride, stride), [(pad, pad), (pad, pad)],
        dimension_numbers=("NCHW", "OIHW", "NCHW"))


def _ref_bn(x, bn):
    gamma, beta, mean, var = bn
    inv = gamma / jnp.sqrt(var + 1e-5)
    return (x - mean[None, :, None, None]) * inv[None, :, None, None] \
        + beta[None, :, None, None]


def ref_forward(block, x):
    out = jax.nn.relu(_ref_bn(_ref_conv(x, block.w1, block.stride, 1), block.bn1))
    out = _ref_bn(_ref_conv(out, block.w2, 1, 1), block.bn2)
    if block.has_downsample:
        res = _ref_bn(_ref_conv(x, block.wd, block.stride, 0), block.bnd)
    else:
        res = x
    return jax.nn.relu(out + res)


# ----------------------------------------------------------------------------
if __name__ == "__main__":
    key = jax.random.PRNGKey(0)
    kx, kb1, kb2 = jax.random.split(key, 3)

    food = [6, 8]
    x = jax.random.normal(kx, (2, 4, 16, 16), jnp.float32)

    # Block 1: stride=2, in_planes != planes -> fused 1x1-downsample path.
    blk1 = BasicBlockPallas(in_planes=4, planes=8, food=food, index=0,
                            stride=2, key=kb1)
    y1 = jax.block_until_ready(blk1(x))
    r1 = ref_forward(blk1, x)
    assert y1.shape == (2, 8, 8, 8), y1.shape
    assert jnp.allclose(y1, r1, atol=1e-4, rtol=1e-4), \
        float(jnp.max(jnp.abs(y1 - r1)))

    # Block 2: stride=1, in_planes == planes -> identity residual path.
    blk2 = BasicBlockPallas(in_planes=8, planes=8, food=food, index=1,
                            stride=1, key=kb2)
    y2 = jax.block_until_ready(blk2(y1))
    r2 = ref_forward(blk2, y1)
    assert y2.shape == (2, 8, 8, 8), y2.shape
    assert jnp.allclose(y2, r2, atol=1e-4, rtol=1e-4), \
        float(jnp.max(jnp.abs(y2 - r2)))

    # bf16 MXU operands with f32 accumulation (perf config) -- loose tolerance
    # against the f32 reference.
    blk1_bf16 = BasicBlockPallas(in_planes=4, planes=8, food=food, index=0,
                                 stride=2, key=kb1,
                                 compute_dtype=jnp.bfloat16)
    y1b = jax.block_until_ready(blk1_bf16(x))
    assert y1b.shape == (2, 8, 8, 8), y1b.shape
    assert jnp.allclose(y1b, r1, atol=0.3, rtol=0.1), \
        float(jnp.max(jnp.abs(y1b - r1)))

    print("KERNEL_OK")
</pallas_src>

<mosaic_0001>
module attributes {stable_mosaic.version = 11 : i64} {
  func.func @_conv_bn_kernel(%arg0: i32, %arg1: i32, %arg2: memref<1x4x9x9x4xf32, #tpu.memory_space<vmem>>, %arg3: memref<36x6xf32, #tpu.memory_space<vmem>>, %arg4: memref<1x6xf32, #tpu.memory_space<vmem>>, %arg5: memref<1x64x6xf32, #tpu.memory_space<vmem>>, %arg6: memref<64x36xf32, #tpu.memory_space<vmem>>) attributes {dimension_semantics = [#tpu.dimension_semantics<parallel>, #tpu.dimension_semantics<parallel>], iteration_bounds = array<i64: 2, 1>, scalar_prefetch = 0 : i64, scratch_operands = 1 : i64, tpu.core_type = #tpu.core_type<tc>, window_params = [{transform_indices = @transform_0, window_bounds = array<i64: 1, 4, 9, 9, 4>}, {pipeline_mode = #tpu.pipeline_mode<synchronous>, transform_indices = @transform_1, window_bounds = array<i64: 36, 6>}, {pipeline_mode = #tpu.pipeline_mode<synchronous>, transform_indices = @transform_2, window_bounds = array<i64: 1, 6>}, {transform_indices = @transform_3, window_bounds = array<i64: 1, 64, 6>}]} {
    %c8_i32 = arith.constant 8 : i32
    %0 = arith.muli %arg1, %c8_i32 : i32
    %1 = tpu.assume_multiple %0, 8 : i32
    %c0_i32 = arith.constant 0 : i32
    %2 = arith.addi %1, %c0_i32 : i32
    %c0 = arith.constant 0 : index
    %c0_0 = arith.constant 0 : index
    %3 = arith.index_cast %2 : i32 to index
    %c0_1 = arith.constant 0 : index
    %c0_2 = arith.constant 0 : index
    %4 = vector.load %arg2[%c0, %c0_0, %3, %c0_1, %c0_2] : memref<1x4x9x9x4xf32, #tpu.memory_space<vmem>>, vector<1x1x8x8x4xf32>
    %5 = vector.shape_cast %4 : vector<1x1x8x8x4xf32> to vector<8x8x4xf32>
    %6 = vector.shape_cast %5 : vector<8x8x4xf32> to vector<64x4xf32>
    %c0_3 = arith.constant 0 : index
    %c0_4 = arith.constant 0 : index
    %7 = vector.load %arg6[%c0_3, %c0_4] : memref<64x36xf32, #tpu.memory_space<vmem>>, vector<64x4xf32>
    tpu.vector_store %arg6[%c0_3, %c0_4], %6 {strides = array<i32>} : memref<64x36xf32, #tpu.memory_space<vmem>>, vector<64x4xf32>,
    %c0_i32_5 = arith.constant 0 : i32
    %8 = arith.addi %1, %c0_i32_5 : i32
    %c0_6 = arith.constant 0 : index
    %c1 = arith.constant 1 : index
    %9 = arith.index_cast %8 : i32 to index
    %c0_7 = arith.constant 0 : index
    %c0_8 = arith.constant 0 : index
    %10 = vector.load %arg2[%c0_6, %c1, %9, %c0_7, %c0_8] : memref<1x4x9x9x4xf32, #tpu.memory_space<vmem>>, vector<1x1x8x8x4xf32>
    %11 = vector.shape_cast %10 : vector<1x1x8x8x4xf32> to vector<8x8x4xf32>
    %12 = vector.shape_cast %11 : vector<8x8x4xf32> to vector<64x4xf32>
    %c0_9 = arith.constant 0 : index
    %c4 = arith.constant 4 : index
    %13 = vector.load %arg6[%c0_9, %c4] : memref<64x36xf32, #tpu.memory_space<vmem>>, vector<64x4xf32>
    tpu.vector_store %arg6[%c0_9, %c4], %12 {strides = array<i32>} : memref<64x36xf32, #tpu.memory_space<vmem>>, vector<64x4xf32>,
    %c0_i32_10 = arith.constant 0 : i32
    %14 = arith.addi %1, %c0_i32_10 : i32
    %c0_11 = arith.constant 0 : index
    %c0_12 = arith.constant 0 : index
    %15 = arith.index_cast %14 : i32 to index
    %c1_13 = arith.constant 1 : index
    %c0_14 = arith.constant 0 : index
    %16 = vector.load %arg2[%c0_11, %c0_12, %15, %c1_13, %c0_14] : memref<1x4x9x9x4xf32, #tpu.memory_space<vmem>>, vector<1x1x8x8x4xf32>
    %17 = vector.shape_cast %16 : vector<1x1x8x8x4xf32> to vector<8x8x4xf32>
    %18 = vector.shape_cast %17 : vector<8x8x4xf32> to vector<64x4xf32>
    %c0_15 = arith.constant 0 : index
    %c8 = arith.constant 8 : index
    %19 = vector.load %arg6[%c0_15, %c8] : memref<64x36xf32, #tpu.memory_space<vmem>>, vector<64x4xf32>
    tpu.vector_store %arg6[%c0_15, %c8], %18 {strides = array<i32>} : memref<64x36xf32, #tpu.memory_space<vmem>>, vector<64x4xf32>,
    %c0_i32_16 = arith.constant 0 : i32
    %20 = arith.addi %1, %c0_i32_16 : i32
    %c0_17 = arith.constant 0 : index
    %c2 = arith.constant 2 : index
    %21 = arith.index_cast %20 : i32 to index
    %c0_18 = arith.constant 0 : index
    %c0_19 = arith.constant 0 : index
    %22 = vector.load %arg2[%c0_17, %c2, %21, %c0_18, %c0_19] : memref<1x4x9x9x4xf32, #tpu.memory_space<vmem>>, vector<1x1x8x8x4xf32>
    %23 = vector.shape_cast %22 : vector<1x1x8x8x4xf32> to vector<8x8x4xf32>
    %24 = vector.shape_cast %23 : vector<8x8x4xf32> to vector<64x4xf32>
    %c0_20 = arith.constant 0 : index
    %c12 = arith.constant 12 : index
    %25 = vector.load %arg6[%c0_20, %c12] : memref<64x36xf32, #tpu.memory_space<vmem>>, vector<64x4xf32>
    tpu.vector_store %arg6[%c0_20, %c12], %24 {strides = array<i32>} : memref<64x36xf32, #tpu.memory_space<vmem>>, vector<64x4xf32>,
    %c0_i32_21 = arith.constant 0 : i32
    %26 = arith.addi %1, %c0_i32_21 : i32
    %c0_22 = arith.constant 0 : index
    %c3 = arith.constant 3 : index
    %27 = arith.index_cast %26 : i32 to index
    %c0_23 = arith.constant 0 : index
    %c0_24 = arith.constant 0 : index
    %28 = vector.load %arg2[%c0_22, %c3, %27, %c0_23, %c0_24] : memref<1x4x9x9x4xf32, #tpu.memory_space<vmem>>, vector<1x1x8x8x4xf32>
    %29 = vector.shape_cast %28 : vector<1x1x8x8x4xf32> to vector<8x8x4xf32>
    %30 = vector.shape_cast %29 : vector<8x8x4xf32> to vector<64x4xf32>
    %c0_25 = arith.constant 0 : index
    %c16 = arith.constant 16 : index
    %31 = vector.load %arg6[%c0_25, %c16] : memref<64x36xf32, #tpu.memory_space<vmem>>, vector<64x4xf32>
    tpu.vector_store %arg6[%c0_25, %c16], %30 {strides = array<i32>} : memref<64x36xf32, #tpu.memory_space<vmem>>, vector<64x4xf32>,
    %c0_i32_26 = arith.constant 0 : i32
    %32 = arith.addi %1, %c0_i32_26 : i32
    %c0_27 = arith.constant 0 : index
    %c2_28 = arith.constant 2 : index
    %33 = arith.index_cast %32 : i32 to index
    %c1_29 = arith.constant 1 : index
    %c0_30 = arith.constant 0 : index
    %34 = vector.load %arg2[%c0_27, %c2_28, %33, %c1_29, %c0_30] : memref<1x4x9x9x4xf32, #tpu.memory_space<vmem>>, vector<1x1x8x8x4xf32>
    %35 = vector.shape_cast %34 : vector<1x1x8x8x4xf32> to vector<8x8x4xf32>
    %36 = vector.shape_cast %35 : vector<8x8x4xf32> to vector<64x4xf32>
    %c0_31 = arith.constant 0 : index
    %c20 = arith.constant 20 : index
    %37 = vector.load %arg6[%c0_31, %c20] : memref<64x36xf32, #tpu.memory_space<vmem>>, vector<64x4xf32>
    tpu.vector_store %arg6[%c0_31, %c20], %36 {strides = array<i32>} : memref<64x36xf32, #tpu.memory_space<vmem>>, vector<64x4xf32>,
    %c1_i32 = arith.constant 1 : i32
    %38 = arith.addi %1, %c1_i32 : i32
    %c0_32 = arith.constant 0 : index
    %c0_33 = arith.constant 0 : index
    %39 = arith.index_cast %38 : i32 to index
    %c0_34 = arith.constant 0 : index
    %c0_35 = arith.constant 0 : index
    %40 = vector.load %arg2[%c0_32, %c0_33, %39, %c0_34, %c0_35] : memref<1x4x9x9x4xf32, #tpu.memory_space<vmem>>, vector<1x1x8x8x4xf32>
    %41 = vector.shape_cast %40 : vector<1x1x8x8x4xf32> to vector<8x8x4xf32>
    %42 = vector.shape_cast %41 : vector<8x8x4xf32> to vector<64x4xf32>
    %c0_36 = arith.constant 0 : index
    %c24 = arith.constant 24 : index
    %43 = vector.load %arg6[%c0_36, %c24] : memref<64x36xf32, #tpu.memory_space<vmem>>, vector<64x4xf32>
    tpu.vector_store %arg6[%c0_36, %c24], %42 {strides = array<i32>} : memref<64x36xf32, #tpu.memory_space<vmem>>, vector<64x4xf32>,
    %c1_i32_37 = arith.constant 1 : i32
    %44 = arith.addi %1, %c1_i32_37 : i32
    %c0_38 = arith.constant 0 : index
    %c1_39 = arith.constant 1 : index
    %45 = arith.index_cast %44 : i32 to index
    %c0_40 = arith.constant 0 : index
    %c0_41 = arith.constant 0 : index
    %46 = vector.load %arg2[%c0_38, %c1_39, %45, %c0_40, %c0_41] : memref<1x4x9x9x4xf32, #tpu.memory_space<vmem>>, vector<1x1x8x8x4xf32>
    %47 = vector.shape_cast %46 : vector<1x1x8x8x4xf32> to vector<8x8x4xf32>
    %48 = vector.shape_cast %47 : vector<8x8x4xf32> to vector<64x4xf32>
    %c0_42 = arith.constant 0 : index
    %c28 = arith.constant 28 : index
    %49 = vector.load %arg6[%c0_42, %c28] : memref<64x36xf32, #tpu.memory_space<vmem>>, vector<64x4xf32>
    tpu.vector_store %arg6[%c0_42, %c28], %48 {strides = array<i32>} : memref<64x36xf32, #tpu.memory_space<vmem>>, vector<64x4xf32>,
    %c1_i32_43 = arith.constant 1 : i32
    %50 = arith.addi %1, %c1_i32_43 : i32
    %c0_44 = arith.constant 0 : index
    %c0_45 = arith.constant 0 : index
    %51 = arith.index_cast %50 : i32 to index
    %c1_46 = arith.constant 1 : index
    %c0_47 = arith.constant 0 : index
    %52 = vector.load %arg2[%c0_44, %c0_45, %51, %c1_46, %c0_47] : memref<1x4x9x9x4xf32, #tpu.memory_space<vmem>>, vector<1x1x8x8x4xf32>
    %53 = vector.shape_cast %52 : vector<1x1x8x8x4xf32> to vector<8x8x4xf32>
    %54 = vector.shape_cast %53 : vector<8x8x4xf32> to vector<64x4xf32>
    %c0_48 = arith.constant 0 : index
    %c32 = arith.constant 32 : index
    %55 = vector.load %arg6[%c0_48, %c32] : memref<64x36xf32, #tpu.memory_space<vmem>>, vector<64x4xf32>
    tpu.vector_store %arg6[%c0_48, %c32], %54 {strides = array<i32>} : memref<64x36xf32, #tpu.memory_space<vmem>>, vector<64x4xf32>,
    %c0_49 = arith.constant 0 : index
    %c0_50 = arith.constant 0 : index
    %56 = vector.load %arg6[%c0_49, %c0_50] : memref<64x36xf32, #tpu.memory_space<vmem>>, vector<64x36xf32>
    %c0_51 = arith.constant 0 : index
    %c0_52 = arith.constant 0 : index
    %57 = vector.load %arg3[%c0_51, %c0_52] : memref<36x6xf32, #tpu.memory_space<vmem>>, vector<36x6xf32>
    %cst = arith.constant dense<0.000000e+00> : vector<64x6xf32>
    %58 = tpu.matmul %56, %57, %cst {dimension_numbers = #tpu.dot_dimension_numbers<[1], [0], [0], [1], [0, 0, 1, 1], [], []>} : vector<64x36xf32>, vector<36x6xf32>, vector<64x6xf32> -> vector<64x6xf32>
    %c0_53 = arith.constant 0 : index
    %c0_54 = arith.constant 0 : index
    %59 = vector.load %arg4[%c0_53, %c0_54] : memref<1x6xf32, #tpu.memory_space<vmem>>, vector<1x6xf32>
    %60 = vector.broadcast %59 : vector<1x6xf32> to vector<64x6xf32>
    %61 = arith.addf %58, %60 : vector<64x6xf32>
    %cst_55 = arith.constant 0.000000e+00 : f32
    %62 = vector.broadcast %cst_55 : f32 to vector<64x6xf32>
    %63 = arith.maximumf %61, %62 : vector<64x6xf32>
    %c0_56 = arith.constant 0 : index
    %c0_57 = arith.constant 0 : index
    %c0_58 = arith.constant 0 : index
    %64 = vector.load %arg5[%c0_56, %c0_57, %c0_58] : memref<1x64x6xf32, #tpu.memory_space<vmem>>, vector<1x64x6xf32>
    %65 = vector.shape_cast %64 : vector<1x64x6xf32> to vector<64x6xf32>
    %66 = vector.shape_cast %63 : vector<64x6xf32> to vector<1x64x6xf32>
    tpu.vector_store %arg5[%c0_56, %c0_57, %c0_58], %66 {strides = array<i32>} : memref<1x64x6xf32, #tpu.memory_space<vmem>>, vector<1x64x6xf32>,
    return
  }
  func.func @transform_0(%arg0: i32, %arg1: i32) -> (i32, i32, i32, i32, i32) {
    %c0_i32 = arith.constant 0 : i32
    %c0_i32_0 = arith.constant 0 : i32
    %c0_i32_1 = arith.constant 0 : i32
    %c0_i32_2 = arith.constant 0 : i32
    %c0_i32_3 = arith.constant 0 : i32
    return %arg0, %c0_i32, %c0_i32_0, %c0_i32_1, %c0_i32_2 : i32, i32, i32, i32, i32
  }
  func.func @transform_1(%arg0: i32, %arg1: i32) -> (i32, i32) {
    %c0_i32 = arith.constant 0 : i32
    %c0_i32_0 = arith.constant 0 : i32
    %c0_i32_1 = arith.constant 0 : i32
    return %c0_i32, %c0_i32_0 : i32, i32
  }
  func.func @transform_2(%arg0: i32, %arg1: i32) -> (i32, i32) {
    %c0_i32 = arith.constant 0 : i32
    %c0_i32_0 = arith.constant 0 : i32
    %c0_i32_1 = arith.constant 0 : i32
    return %c0_i32, %c0_i32_0 : i32, i32
  }
  func.func @transform_3(%arg0: i32, %arg1: i32) -> (i32, i32, i32) {
    %c0_i32 = arith.constant 0 : i32
    %c0_i32_0 = arith.constant 0 : i32
    return %arg0, %arg1, %c0_i32 : i32, i32, i32
  }
}

</mosaic_0001>

<bundles_post_ra>
// kernel: tpu_custom_call.1
= control target key start
LH: loop header
LB: loop body
LE: loop exit
PB: predicated region body
PF: predicated region fallthrough
CT: control target
= control target key end

     0   :  { %s1099_s12 = smov 0   ;;  %s1101_s13 = smov 0   ;;  %s1427_s0 = inlined_call_operand.vmem [shape: f32[2,4,9,9,4], index: 0, kind: input, shape index: {}]   ;;  %s1428_s1 = inlined_call_operand.vmem [shape: f32[36,6], index: 1, kind: input, shape index: {}]   ;;  %s1429_s2 = inlined_call_operand.vmem [shape: f32[1,6], index: 2, kind: input, shape index: {}]   ;;  %s1430_s3 = inlined_call_operand.vmem [shape: f32[2,64,6], index: 3, kind: output, shape index: {}]  }
   0x1   :  { %s1103_s14 = smov 0  }
   0x2 LB: > { %s25_s15 = sadd.s32 1, %s1065_s13  ;;  %p892_p0 = scmp.ge.s32.totalorder %s1069_s14, 1  ;;  %s1069_s14 = sphi %s1103_s14, %s13_s14   ;;  %s1065_s13 = sphi %s1101_s13, %s1432_s13   ;;  %s1061_s12 = sphi %s1099_s12, %s1431_s12  }
   0x3   : > { %p27_p1 = scmp.ge.s32.totalorder %s25_s15, 2  ;;  %p151_p2 = scmp.lt.s32.totalorder %s1069_s14, 3 }
   0x5   : > { %s1434_s15 = smov (%p27_p1, %s25_s15), 0  ;;  %p152_p3 = pnand %p892_p0, %p151_p2 }
   0x6   : > { %p179_p4 = scmp.lt.s32.totalorder (!%p152_p3), %s1061_s12, 1  ;;  %s1071_s20 = smov (!%p152_p3), 4   ;;  %vm205_vm0 = vcmask (!%p152_p3), 31744   ;;  %v625_v42 = vld [vmem:[%s1428_s1] sm:$0xff] (!%p152_p3)  ;;  %v626_v43 = vld [vmem:[%s1428_s1 + $0x8] sm:$0xff] (!%p152_p3)  ;;  %v627_v45 = vld [vmem:[%s1428_s1 + $0x10] sm:$0xff] (!%p152_p3) }
   0x7   : > { %155 = sbr.rel (%p152_p3) target bundleno = 485 (0x1e5), region = 32  ;;  %s1072_s21 = smov (!%p152_p3), 8   ;;  %v1000_v44 = vpack.c.bf16 (!%p152_p3), %v626_v43, %v625_v42  ;;  %v628_v46 = vld [vmem:[%s1428_s1 + $0x18] sm:$0xff] (!%p152_p3)  ;;  %v629_v50 = vld [vmem:[%s1428_s1 + $0x20] sm:$0xf] (!%p152_p3)  ;;  %vm662_vm1 = vcmask (!%p152_p3), 1043456  }
   0x8   : > { %s1073_s22 = smov (!%p152_p3), 12   ;;  %s1074_s23 = smov (!%p152_p3), 16   ;;  %v1004_v47 = vpack.c.bf16 (!%p152_p3), %v628_v46, %v627_v45  ;;  %vm256_vm2 = vcmask (!%p152_p3), 64544   ;;  %vm305_vm3 = vcmask (!%p152_p3), 97344   ;;  %vm356_vm4 = vcmask (!%p152_p3), 130144  }
   0x9   : > { %s1075_s24 = smov (!%p152_p3), 20   ;;  %s1076_s25 = smov (!%p152_p3), 24   ;;  %1001 = vmatprep.subr.bf16.mxu0 (!%p152_p3), %v1000_v44  ;;  %1008 = vmatprep.subr.bf16.mxu1 (!%p152_p3), %v1000_v44  ;;  %vm407_vm5 = vcmask (!%p152_p3), 162944   ;;  %vm456_vm6 = vcmask (!%p152_p3), 195744   ;;  %vm508_vm7 = vcmask (!%p152_p3), 228544   ;;  %vm559_vm8 = vcmask (!%p152_p3), 261344  }
   0xa   : > { %s1077_s26 = smov (!%p152_p3), 28   ;;  %1003 = vmatpush3.bf16.msra.mxu0 (!%p152_p3), %v1000_v44  ;;  %1011 = vmatpush3.bf16.msra.mxu1 (!%p152_p3), %v1000_v44  ;;  %s1078_s8 = smov (!%p152_p3), 32   ;;  %vm608_vm9 = vcmask (!%p152_p3), 294144   ;;  %vm637_vm10 = vcmask (!%p152_p3), 293888   ;;  %vm779_vm11 = vcmask (!%p152_p3), 48128  }
   0xb   : > { %1005 = vmatprep.subr.bf16.mxu0 (!%p152_p3), %v1004_v47  ;;  %1009 = vmatprep.subr.bf16.mxu1 (!%p152_p3), %v1004_v47 }
   0xe   : > { %s1436_s12 = smov (!%p179_p4, %s1061_s12), 1  ;;  %1007 = vmatpush3.bf16.msra.mxu0 %v1004_v47  ;;  %1012 = vmatpush3.bf16.msra.mxu1 %v1004_v47 }
   0xf   : > { %s1014_s16 = smul.u32 576, %s1436_s12  ;;  %986 = vmatprep.subr.msk.mxu0 %vm662_vm1, %v629_v50  ;;  %1010 = vmatprep.subr.msk.mxu1 %vm662_vm1, %v629_v50  ;;  %s964_s17 = sshll.u32 %s1436_s12, 6 }
  0x11   : > { %s1123_s19 = scalar_lea.vmem %s1427_s0, %s1014_s16 }
  0x12   : > { %v1126_v0 = vld [vmem:[%s1123_s19 + $0xa0] sm:$0xff]  ;;  %v896_v1 = vld [vmem:[%s1123_s19 + $0x90] sm:$0xff]  ;;  %987 = vmatpush3.msk.msra.mxu0 %vm662_vm1, %v629_v50  ;;  %1013 = vmatpush3.msk.msra.mxu1 %vm662_vm1, %v629_v50 }
  0x13   : > { %234 = vrot.lane.b32.xlu1 %v1126_v0, %s1071_s20  ;;  %232 = vrot.lane.b32.xlu0 %v896_v1, %s1071_s20  ;;  %v1133_v2 = vld [vmem:[%s1123_s19 + $0xe0] sm:$0xff]  ;;  %v1136_v3 = vld [vmem:[%s1123_s19 + $0xd0] sm:$0xff] }
  0x14   : > { %v1143_v4 = vld [vmem:[%s1123_s19 + $0x41] sm:$0xff]  ;;  %v932_v6 = vld [vmem:[%s1123_s19 + $0x50] sm:$0xff] }
  0x15   : > { %v265_v5 = vld [vmem:[%s1123_s19 + $0x1] sm:$0xff]  ;;  %v1151_v7 = vld [vmem:[%s1123_s19 + $0x51] sm:$0xff]  ;;  %211 = vst.msk [vmem:[#allocation2 + $0x28] sm:$0xff] %vm205_vm0, %v932_v6 }
  0x16   : > { %v1154_v8 = vld [vmem:[%s1123_s19 + $0x11] sm:$0xff]  ;;  %v1159_v10 = vld [vmem:[%s1123_s19 + $0x60] sm:$0xff] }
  0x17   : > { %242 = vrot.lane.b32.xlu1 %v1133_v2, %s1071_s20  ;;  %240 = vrot.lane.b32.xlu0 %v1136_v3, %s1071_s20  ;;  %v928_v9 = vld [vmem:[%s1123_s19 + $0x10] sm:$0xff]  ;;  %v1163_v11 = vld [vmem:[%s1123_s19 + $0x20] sm:$0xff]  ;;  %212 = vst.msk [vmem:[#allocation2 + $0x30] sm:$0xff] %vm205_vm0, %v1159_v10 }
  0x18   : > { %207 = vst.msk [vmem:[#allocation2 + $0x8] sm:$0xff] %vm205_vm0, %v928_v9  ;;  %208 = vst.msk [vmem:[#allocation2 + $0x10] sm:$0xff] %vm205_vm0, %v1163_v11  ;;  %v908_v12 = vld [vmem:[%s1123_s19 + $0x160] sm:$0xff]  ;;  %v1176_v14 = vld [vmem:[%s1123_s19 + $0x70] sm:$0xff] }
  0x19   : > { %v904_v13 = vld [vmem:[%s1123_s19 + $0x120] sm:$0xff]  ;;  %v1179_v15 = vld [vmem:[%s1123_s19 + $0x30] sm:$0xff]  ;;  %213 = vst.msk [vmem:[#allocation2 + $0x38] sm:$0xff] %vm205_vm0, %v1176_v14 }
  0x1a   : > { %v1184_v16 = vld [vmem:[%s1123_s19 + $0x40] sm:$0xff]  ;;  %209 = vst.msk [vmem:[#allocation2 + $0x18] sm:$0xff] %vm205_vm0, %v1179_v15  ;;  %v909_v18 = vld [vmem:[%s1123_s19 + $0x170] sm:$0xff] }
  0x1b   : > { %289 = vrot.lane.b32.xlu1 %v1143_v4, %s1072_s21  ;;  %281 = vrot.lane.b32.xlu0 %v265_v5, %s1072_s21  ;;  %v197_v17 = vld [vmem:[%s1123_s19] sm:$0xff]  ;;  %v905_v19 = vld [vmem:[%s1123_s19 + $0x130] sm:$0xff]  ;;  %210 = vst.msk [vmem:[#allocation2 + $0x20] sm:$0xff] %vm205_vm0, %v1184_v16 }
  0x1c   : > { %206 = vst.msk [vmem:[#allocation2] sm:$0xff] %vm205_vm0, %v197_v17  ;;  %v916_v20 = vld [vmem:[%s1123_s19 + $0x1f0] sm:$0xff]  ;;  %v917_v24 = vld [vmem:[%s1123_s19 + $0x200] sm:$0xff] }
  0x1d   : > { %v912_v21 = vld [vmem:[%s1123_s19 + $0x1b0] sm:$0xff]  ;;  %v913_v25 = vld [vmem:[%s1123_s19 + $0x1c0] sm:$0xff] }
  0x1e   : > { %v902_v22 = vld [vmem:[%s1123_s19 + $0xf0] sm:$0xff]  ;;  %v924_v26 = vld [vmem:[%s1123_s19 + $0x161] sm:$0xff] }
  0x1f   : > { %291 = vrot.lane.b32.xlu1 %v1151_v7, %s1072_s21  ;;  %283 = vrot.lane.b32.xlu0 %v1154_v8, %s1072_s21  ;;  %v898_v23 = vld [vmem:[%s1123_s19 + $0xb0] sm:$0xff]  ;;  %v920_v27 = vld [vmem:[%s1123_s19 + $0x121] sm:$0xff] }
  0x20   : > { %v1215_v28 = vld [vmem:[%s1123_s19 + $0x100] sm:$0xff]  ;;  %v925_v32 = vld [vmem:[%s1123_s19 + $0x171] sm:$0xff] }
  0x21   : > { %v1218_v29 = vld [vmem:[%s1123_s19 + $0xc0] sm:$0xff]  ;;  %v921_v33 = vld [vmem:[%s1123_s19 + $0x131] sm:$0xff] }
  0x22   : > { %v1225_v30 = vld [vmem:[%s1123_s19 + $0x61] sm:$0xff]  ;;  %v1241_v34 = vld [vmem:[%s1123_s19 + $0x71] sm:$0xff] }
  0x23   : > { %340 = vrot.lane.b32.xlu1 %v908_v12, %s1073_s22  ;;  %332 = vrot.lane.b32.xlu0 %v904_v13, %s1073_s22  ;;  %v1228_v31 = vld [vmem:[%s1123_s19 + $0x21] sm:$0xff]  ;;  %v1244_v35 = vld [vmem:[%s1123_s19 + $0x31] sm:$0xff] }
  0x24   : > { %v910_v36 = vld [vmem:[%s1123_s19 + $0x180] sm:$0xff]  ;;  %v911_v38 = vld [vmem:[%s1123_s19 + $0x190] sm:$0xff] }
  0x25   : > { %v906_v37 = vld [vmem:[%s1123_s19 + $0x140] sm:$0xff]  ;;  %v907_v39 = vld [vmem:[%s1123_s19 + $0x150] sm:$0xff] }
  0x26   : > { %v918_v40 = vld [vmem:[%s1123_s19 + $0x210] sm:$0xff]  ;;  %v919_v48 = vld [vmem:[%s1123_s19 + $0x220] sm:$0xff] }
  0x27   : > { %342 = vrot.lane.b32.xlu1 %v909_v18, %s1073_s22  ;;  %334 = vrot.lane.b32.xlu0 %v905_v19, %s1073_s22  ;;  %v914_v41 = vld [vmem:[%s1123_s19 + $0x1d0] sm:$0xff]  ;;  %v915_v49 = vld [vmem:[%s1123_s19 + $0x1e0] sm:$0xff] }
  0x28   : > { %v926_v51 = vld [vmem:[%s1123_s19 + $0x181] sm:$0xff]  ;;  %v927_v53 = vld [vmem:[%s1123_s19 + $0x191] sm:$0xff] }
  0x29   : > { %v922_v52 = vld [vmem:[%s1123_s19 + $0x141] sm:$0xff]  ;;  %v923_v54 = vld [vmem:[%s1123_s19 + $0x151] sm:$0xff] }
  0x2a   : > { %v935_v55 = vld [vmem:[%s1123_s19 + $0x80] sm:$0xff]  ;;  %v943_v56 = vld [vmem:[%s1123_s19 + $0x110] sm:$0xff] }
  0x2b   : > { %391 = vrot.lane.b32.xlu1 %v916_v20, %s1074_s23  ;;  %383 = vrot.lane.b32.xlu0 %v912_v21, %s1074_s23  ;;  %v951_v61 = vld [vmem:[%s1123_s19 + $0x81] sm:$0xff] }
  0x2f   : > { %244 = vrot.lane.b32.xlu1 %v902_v22, %s1071_s20  ;;  %236 = vrot.lane.b32.xlu0 %v898_v23, %s1071_s20 }
  0x33   : > { %393 = vrot.lane.b32.xlu1 %v917_v24, %s1074_s23  ;;  %385 = vrot.lane.b32.xlu0 %v913_v25, %s1074_s23 }
  0x37   : > { %440 = vrot.lane.b32.xlu1 %v924_v26, %s1075_s24  ;;  %432 = vrot.lane.b32.xlu0 %v920_v27, %s1075_s24 }
  0x3b   : > { %246 = vrot.lane.b32.xlu1 %v1215_v28, %s1071_s20  ;;  %238 = vrot.lane.b32.xlu0 %v1218_v29, %s1071_s20  ;;  %s192_s20 = scalar_lea.vmem %s1430_s3, %s964_s17 }
  0x3f   : > { %293 = vrot.lane.b32.xlu1 %v1225_v30, %s1072_s21  ;;  %285 = vrot.lane.b32.xlu0 %v1228_v31, %s1072_s21 }
  0x43   : > { %442 = vrot.lane.b32.xlu1 %v925_v32, %s1075_s24  ;;  %434 = vrot.lane.b32.xlu0 %v921_v33, %s1075_s24 }
  0x47   : > { %492 = vrot.lane.b32.xlu1 %v932_v6, %s1076_s25  ;;  %484 = vrot.lane.b32.xlu0 %v928_v9, %s1076_s25 }
  0x4b   : > { %295 = vrot.lane.b32.xlu1 %v1241_v34, %s1072_s21  ;;  %287 = vrot.lane.b32.xlu0 %v1244_v35, %s1072_s21 }
  0x4f   : > { %344 = vrot.lane.b32.xlu1 %v910_v36, %s1073_s22  ;;  %336 = vrot.lane.b32.xlu0 %v906_v37, %s1073_s22 }
  0x53   : > { %494 = vrot.lane.b32.xlu1 %v1159_v10, %s1076_s25  ;;  %486 = vrot.lane.b32.xlu0 %v1163_v11, %s1076_s25 }
  0x57   : > { %543 = vrot.lane.b32.xlu1 %v1133_v2, %s1077_s26  ;;  %535 = vrot.lane.b32.xlu0 %v1126_v0, %s1077_s26 }
  0x5b   : > { %346 = vrot.lane.b32.xlu1 %v911_v38, %s1073_s22  ;;  %338 = vrot.lane.b32.xlu0 %v907_v39, %s1073_s22 }
  0x5f   : > { %395 = vrot.lane.b32.xlu1 %v918_v40, %s1074_s23  ;;  %387 = vrot.lane.b32.xlu0 %v914_v41, %s1074_s23 }
  0x63   : > { %545 = vrot.lane.b32.xlu1 %v902_v22, %s1077_s26  ;;  %537 = vrot.lane.b32.xlu0 %v898_v23, %s1077_s26 }
  0x67   : > { %592 = vrot.lane.b32.xlu1 %v1151_v7, %s1078_s8  ;;  %584 = vrot.lane.b32.xlu0 %v1154_v8, %s1078_s8 }
  0x6b   : > { %397 = vrot.lane.b32.xlu1 %v919_v48, %s1074_s23  ;;  %389 = vrot.lane.b32.xlu0 %v915_v49, %s1074_s23 }
  0x6f   : > { %444 = vrot.lane.b32.xlu1 %v926_v51, %s1075_s24  ;;  %436 = vrot.lane.b32.xlu0 %v922_v52, %s1075_s24 }
  0x73   : > { %594 = vrot.lane.b32.xlu1 %v1225_v30, %s1078_s8  ;;  %586 = vrot.lane.b32.xlu0 %v1228_v31, %s1078_s8 }
  0x77   : > { %446 = vrot.lane.b32.xlu1 %v927_v53, %s1075_s24  ;;  %438 = vrot.lane.b32.xlu0 %v923_v54, %s1075_s24 }
  0x7b   : > { %496 = vrot.lane.b32.xlu1 %v1176_v14, %s1076_s25  ;;  %488 = vrot.lane.b32.xlu0 %v1179_v15, %s1076_s25 }
  0x7f   : > { %498 = vrot.lane.b32.xlu1 %v935_v55, %s1076_s25  ;;  %490 = vrot.lane.b32.xlu0 %v1184_v16, %s1076_s25 }
  0x83   : > { %547 = vrot.lane.b32.xlu1 %v1215_v28, %s1077_s26  ;;  %539 = vrot.lane.b32.xlu0 %v1218_v29, %s1077_s26 }
  0x85   : > { %v235_v57 = vpop.permute.xlu1 %234  ;;  %v233_v58 = vpop.permute.xlu0 %232 }
  0x86   : > { %258 = vst.msk [vmem:[#allocation2 + $0x8] sm:$0xff] %vm256_vm2, %v235_v57  ;;  %257 = vst.msk [vmem:[#allocation2] sm:$0xff] %vm256_vm2, %v233_v58 }
  0x87   : > { %549 = vrot.lane.b32.xlu1 %v943_v56, %s1077_s26  ;;  %541 = vrot.lane.b32.xlu0 %v1136_v3, %s1077_s26 }
  0x89   : > { %v243_v59 = vpop.permute.xlu1 %242  ;;  %v241_v60 = vpop.permute.xlu0 %240 }
  0x8a   : > { %262 = vst.msk [vmem:[#allocation2 + $0x28] sm:$0xff] %vm256_vm2, %v243_v59  ;;  %261 = vst.msk [vmem:[#allocation2 + $0x20] sm:$0xff] %vm256_vm2, %v241_v60 }
  0x8b   : > { %596 = vrot.lane.b32.xlu1 %v1241_v34, %s1078_s8  ;;  %588 = vrot.lane.b32.xlu0 %v1244_v35, %s1078_s8 }
  0x8d   : > { %v290_v62 = vpop.permute.xlu1 %289  ;;  %v282_v63 = vpop.permute.xlu0 %281 }
  0x8e   : > { %310 = vst.msk [vmem:[#allocation2 + $0x20] sm:$0xff] %vm305_vm3, %v290_v62  ;;  %306 = vst.msk [vmem:[#allocation2] sm:$0xff] %vm305_vm3, %v282_v63 }
  0x8f   : > { %598 = vrot.lane.b32.xlu1 %v951_v61, %s1078_s8  ;;  %590 = vrot.lane.b32.xlu0 %v1143_v4, %s1078_s8 }
  0x91   : > { %v292_v0 = vpop.permute.xlu1 %291  ;;  %v284_v1 = vpop.permute.xlu0 %283 }
  0x92   : > { %311 = vst.msk [vmem:[#allocation2 + $0x28] sm:$0xff] %vm305_vm3, %v292_v0  ;;  %307 = vst.msk [vmem:[#allocation2 + $0x8] sm:$0xff] %vm305_vm3, %v284_v1 }
  0x95   : > { %v341_v2 = vpop.permute.xlu1 %340  ;;  %v333_v3 = vpop.permute.xlu0 %332 }
  0x96   : > { %361 = vst.msk [vmem:[#allocation2 + $0x20] sm:$0xff] %vm356_vm4, %v341_v2  ;;  %357 = vst.msk [vmem:[#allocation2] sm:$0xff] %vm356_vm4, %v333_v3  ;;  %v952_v2 = vld [vmem:[%s1429_s2] ss:$0 sm:$0xff] }
  0x99   : > { %v343_v5 = vpop.permute.xlu1 %342  ;;  %v335_v6 = vpop.permute.xlu0 %334 }
  0x9a   : > { %362 = vst.msk [vmem:[#allocation2 + $0x28] sm:$0xff] %vm356_vm4, %v343_v5  ;;  %358 = vst.msk [vmem:[#allocation2 + $0x8] sm:$0xff] %vm356_vm4, %v335_v6 }
  0x9d   : > { %v392_v4 = vpop.permute.xlu1 %391  ;;  %v384_v7 = vpop.permute.xlu0 %383 }
  0x9e   : > { %412 = vst.msk [vmem:[#allocation2 + $0x20] sm:$0xff] %vm407_vm5, %v392_v4  ;;  %408 = vst.msk [vmem:[#allocation2] sm:$0xff] %vm407_vm5, %v384_v7 }
  0xa1   : > { %v245_v8 = vpop.permute.xlu1 %244  ;;  %v237_v9 = vpop.permute.xlu0 %236 }
  0xa2   : > { %263 = vst.msk [vmem:[#allocation2 + $0x30] sm:$0xff] %vm256_vm2, %v245_v8  ;;  %259 = vst.msk [vmem:[#allocation2 + $0x10] sm:$0xff] %vm256_vm2, %v237_v9 }
  0xa5   : > { %v394_v10 = vpop.permute.xlu1 %393  ;;  %v386_v11 = vpop.permute.xlu0 %385 }
  0xa6   : > { %413 = vst.msk [vmem:[#allocation2 + $0x28] sm:$0xff] %vm407_vm5, %v394_v10  ;;  %409 = vst.msk [vmem:[#allocation2 + $0x8] sm:$0xff] %vm407_vm5, %v386_v11 }
  0xa9   : > { %v441_v12 = vpop.permute.xlu1 %440  ;;  %v433_v13 = vpop.permute.xlu0 %432 }
  0xaa   : > { %461 = vst.msk [vmem:[#allocation2 + $0x20] sm:$0xff] %vm456_vm6, %v441_v12  ;;  %457 = vst.msk [vmem:[#allocation2] sm:$0xff] %vm456_vm6, %v433_v13 }
  0xad   : > { %v247_v14 = vpop.permute.xlu1 %246  ;;  %v239_v15 = vpop.permute.xlu0 %238 }
  0xae   : > { %264 = vst.msk [vmem:[#allocation2 + $0x38] sm:$0xff] %vm256_vm2, %v247_v14  ;;  %260 = vst.msk [vmem:[#allocation2 + $0x18] sm:$0xff] %vm256_vm2, %v239_v15 }
  0xb1   : > { %v294_v16 = vpop.permute.xlu1 %293  ;;  %v286_v17 = vpop.permute.xlu0 %285 }
  0xb2   : > { %312 = vst.msk [vmem:[#allocation2 + $0x30] sm:$0xff] %vm305_vm3, %v294_v16  ;;  %308 = vst.msk [vmem:[#allocation2 + $0x10] sm:$0xff] %vm305_vm3, %v286_v17 }
  0xb5   : > { %v443_v18 = vpop.permute.xlu1 %442  ;;  %v435_v19 = vpop.permute.xlu0 %434 }
  0xb6   : > { %462 = vst.msk [vmem:[#allocation2 + $0x28] sm:$0xff] %vm456_vm6, %v443_v18  ;;  %458 = vst.msk [vmem:[#allocation2 + $0x8] sm:$0xff] %vm456_vm6, %v435_v19 }
  0xb9   : > { %v493_v20 = vpop.permute.xlu1 %492  ;;  %v485_v21 = vpop.permute.xlu0 %484 }
  0xba   : > { %513 = vst.msk [vmem:[#allocation2 + $0x20] sm:$0xff] %vm508_vm7, %v493_v20  ;;  %509 = vst.msk [vmem:[#allocation2] sm:$0xff] %vm508_vm7, %v485_v21 }
  0xbd   : > { %v296_v22 = vpop.permute.xlu1 %295  ;;  %v288_v23 = vpop.permute.xlu0 %287 }
  0xbe   : > { %313 = vst.msk [vmem:[#allocation2 + $0x38] sm:$0xff] %vm305_vm3, %v296_v22  ;;  %309 = vst.msk [vmem:[#allocation2 + $0x18] sm:$0xff] %vm305_vm3, %v288_v23 }
  0xc1   : > { %v345_v24 = vpop.permute.xlu1 %344  ;;  %v337_v25 = vpop.permute.xlu0 %336 }
  0xc2   : > { %363 = vst.msk [vmem:[#allocation2 + $0x30] sm:$0xff] %vm356_vm4, %v345_v24  ;;  %359 = vst.msk [vmem:[#allocation2 + $0x10] sm:$0xff] %vm356_vm4, %v337_v25 }
  0xc5   : > { %v495_v26 = vpop.permute.xlu1 %494  ;;  %v487_v27 = vpop.permute.xlu0 %486 }
  0xc6   : > { %514 = vst.msk [vmem:[#allocation2 + $0x28] sm:$0xff] %vm508_vm7, %v495_v26  ;;  %510 = vst.msk [vmem:[#allocation2 + $0x8] sm:$0xff] %vm508_vm7, %v487_v27 }
  0xc9   : > { %v544_v28 = vpop.permute.xlu1 %543  ;;  %v536_v29 = vpop.permute.xlu0 %535 }
  0xca   : > { %564 = vst.msk [vmem:[#allocation2 + $0x20] sm:$0xff] %vm559_vm8, %v544_v28  ;;  %560 = vst.msk [vmem:[#allocation2] sm:$0xff] %vm559_vm8, %v536_v29 }
  0xcd   : > { %v347_v30 = vpop.permute.xlu1 %346  ;;  %v339_v31 = vpop.permute.xlu0 %338 }
  0xce   : > { %364 = vst.msk [vmem:[#allocation2 + $0x38] sm:$0xff] %vm356_vm4, %v347_v30  ;;  %360 = vst.msk [vmem:[#allocation2 + $0x18] sm:$0xff] %vm356_vm4, %v339_v31 }
  0xd1   : > { %v396_v32 = vpop.permute.xlu1 %395  ;;  %v388_v33 = vpop.permute.xlu0 %387 }
  0xd2   : > { %414 = vst.msk [vmem:[#allocation2 + $0x30] sm:$0xff] %vm407_vm5, %v396_v32  ;;  %410 = vst.msk [vmem:[#allocation2 + $0x10] sm:$0xff] %vm407_vm5, %v388_v33 }
  0xd5   : > { %v546_v34 = vpop.permute.xlu1 %545  ;;  %v538_v35 = vpop.permute.xlu0 %537 }
  0xd6   : > { %565 = vst.msk [vmem:[#allocation2 + $0x28] sm:$0xff] %vm559_vm8, %v546_v34  ;;  %561 = vst.msk [vmem:[#allocation2 + $0x8] sm:$0xff] %vm559_vm8, %v538_v35 }
  0xd9   : > { %v593_v36 = vpop.permute.xlu1 %592  ;;  %v585_v37 = vpop.permute.xlu0 %584 }
  0xda   : > { %613 = vst.msk [vmem:[#allocation2 + $0x20] sm:$0xff] %vm608_vm9, %v593_v36  ;;  %609 = vst.msk [vmem:[#allocation2] sm:$0xff] %vm608_vm9, %v585_v37 }
  0xdd   : > { %v398_v38 = vpop.permute.xlu1 %397  ;;  %v390_v39 = vpop.permute.xlu0 %389 }
  0xde   : > { %415 = vst.msk [vmem:[#allocation2 + $0x38] sm:$0xff] %vm407_vm5, %v398_v38  ;;  %411 = vst.msk [vmem:[#allocation2 + $0x18] sm:$0xff] %vm407_vm5, %v390_v39 }
  0xe1   : > { %v445_v40 = vpop.permute.xlu1 %444  ;;  %v437_v41 = vpop.permute.xlu0 %436  ;;  %v617_v42 = vld [vmem:[#allocation2] sm:$0xff] }
  0xe2   : > { %v621_v43 = vld [vmem:[#allocation2 + $0x20] sm:$0xff]  ;;  %463 = vst.msk [vmem:[#allocation2 + $0x30] sm:$0xff] %vm456_vm6, %v445_v40  ;;  %459 = vst.msk [vmem:[#allocation2 + $0x10] sm:$0xff] %vm456_vm6, %v437_v41  ;;  %988 = vmatprep.mubr.msk.f32.mxu0 %vm637_vm10, %v617_v42 }
  0xe3   : > { %994 = vmatprep.mubr.msk.f32.mxu1 %vm637_vm10, %v621_v43 }
  0xe5   : > { %v595_v44 = vpop.permute.xlu1 %594  ;;  %v587_v45 = vpop.permute.xlu0 %586 }
  0xe6   : > { %614 = vst.msk [vmem:[#allocation2 + $0x28] sm:$0xff] %vm608_vm9, %v595_v44  ;;  %610 = vst.msk [vmem:[#allocation2 + $0x8] sm:$0xff] %vm608_vm9, %v587_v45 }
  0xe9   : > { %v447_v46 = vpop.permute.xlu1 %446  ;;  %v439_v47 = vpop.permute.xlu0 %438 }
  0xea   : > { %464 = vst.msk [vmem:[#allocation2 + $0x38] sm:$0xff] %vm456_vm6, %v447_v46  ;;  %460 = vst.msk [vmem:[#allocation2 + $0x18] sm:$0xff] %vm456_vm6, %v439_v47 }
  0xed   : > { %v497_v48 = vpop.permute.xlu1 %496  ;;  %v489_v49 = vpop.permute.xlu0 %488  ;;  %v618_v50 = vld [vmem:[#allocation2 + $0x8] sm:$0xff] }
  0xee   : > { %v622_v51 = vld [vmem:[#allocation2 + $0x28] sm:$0xff]  ;;  %515 = vst.msk [vmem:[#allocation2 + $0x30] sm:$0xff] %vm508_vm7, %v497_v48  ;;  %511 = vst.msk [vmem:[#allocation2 + $0x10] sm:$0xff] %vm508_vm7, %v489_v49  ;;  %989 = vmatmul.mubr.msk.f32.vlgmr.msra.gmra.mrb[0].mxu0 %vm637_vm10, %v618_v50 }
  0xef   : > { %995 = vmatmul.mubr.msk.f32.vlgmr.msra.gmra.mrb[0].mxu1 %vm637_vm10, %v622_v51 }
  0xf1   : > { %v499_v52 = vpop.permute.xlu1 %498  ;;  %v491_v53 = vpop.permute.xlu0 %490 }
  0xf2   : > { %516 = vst.msk [vmem:[#allocation2 + $0x38] sm:$0xff] %vm508_vm7, %v499_v52  ;;  %512 = vst.msk [vmem:[#allocation2 + $0x18] sm:$0xff] %vm508_vm7, %v491_v53 }
  0xf5   : > { %v548_v54 = vpop.permute.xlu1 %547  ;;  %v540_v55 = vpop.permute.xlu0 %539 }
  0xf6   : > { %566 = vst.msk [vmem:[#allocation2 + $0x30] sm:$0xff] %vm559_vm8, %v548_v54  ;;  %562 = vst.msk [vmem:[#allocation2 + $0x10] sm:$0xff] %vm559_vm8, %v540_v55 }
  0xf9   : > { %v550_v56 = vpop.permute.xlu1 %549  ;;  %v542_v57 = vpop.permute.xlu0 %541 }
  0xfa   : > { %567 = vst.msk [vmem:[#allocation2 + $0x38] sm:$0xff] %vm559_vm8, %v550_v56  ;;  %563 = vst.msk [vmem:[#allocation2 + $0x18] sm:$0xff] %vm559_vm8, %v542_v57 }
  0xfd   : > { %v597_v58 = vpop.permute.xlu1 %596  ;;  %v589_v59 = vpop.permute.xlu0 %588 }
  0xfe   : > { %615 = vst.msk [vmem:[#allocation2 + $0x30] sm:$0xff] %vm608_vm9, %v597_v58  ;;  %611 = vst.msk [vmem:[#allocation2 + $0x10] sm:$0xff] %vm608_vm9, %v589_v59 }
 0x101   : > { %v599_v60 = vpop.permute.xlu1 %598  ;;  %v591_v61 = vpop.permute.xlu0 %590 }
 0x102   : > { %616 = vst.msk [vmem:[#allocation2 + $0x38] sm:$0xff] %vm608_vm9, %v599_v60  ;;  %612 = vst.msk [vmem:[#allocation2 + $0x18] sm:$0xff] %vm608_vm9, %v591_v61 }
 0x105   : > { %v619_v62 = vld [vmem:[#allocation2 + $0x10] sm:$0xff] }
 0x106   : > { %v623_v63 = vld [vmem:[#allocation2 + $0x30] sm:$0xff]  ;;  %991 = vmatprep.mubr.msk.f32.mxu0 %vm637_vm10, %v619_v62 }
 0x107   : > { %997 = vmatprep.mubr.msk.f32.mxu1 %vm637_vm10, %v623_v63 }
 0x109   : > { %v620_v0 = vld [vmem:[#allocation2 + $0x18] sm:$0xff] }
 0x10a   : > { %v624_v1 = vld [vmem:[#allocation2 + $0x38] sm:$0xff]  ;;  %992 = vmatmul.mubr.msk.f32.gmra.mrb[2].mxu0 %vm637_vm10, %v620_v0 }
 0x10b   : > { %998 = vmatmul.mubr.msk.f32.gmra.mrb[2].mxu1 %vm637_vm10, %v624_v1 }
 0x1c1   : > { %v990_v3 = vpop.f32.mrb[0].mxu0 }
 0x1c2   : > { %v996_v5 = vpop.f32.mrb[0].mxu1  ;;  %v738_v6 = vadd.f32 %v990_v3, %v952_v2  ;;  %v732_v7 = vpop.f32.mrb[1].mxu0 }
 0x1c3   : > { %v758_v4 = vadd.f32 %v996_v5, %v952_v2  ;;  %v752_v8 = vpop.f32.mrb[1].mxu1  ;;  %v733_v9 = vadd.f32 %v952_v2, %v732_v7 }
 0x1c4   : > { %v753_v10 = vadd.f32 %v952_v2, %v752_v8  ;;  %v772_v11 = vmax.f32 %v738_v6, 0.0 }
 0x1c5   : > { %v776_v12 = vmax.f32 %v758_v4, 0.0  ;;  %v771_v13 = vmax.f32 %v733_v9, 0.0 }
 0x1c6   : > { %v775_v14 = vmax.f32 %v753_v10, 0.0  ;;  %781 = vst.msk [vmem:[%s192_s20 + $0x8] sm:$0xff] %vm779_vm11, %v772_v11 }
 0x1c7   : > { %785 = vst.msk [vmem:[%s192_s20 + $0x28] sm:$0xff] %vm779_vm11, %v776_v12  ;;  %780 = vst.msk [vmem:[%s192_s20] sm:$0xff] %vm779_vm11, %v771_v13 }
 0x1c8   : > { %784 = vst.msk [vmem:[%s192_s20 + $0x20] sm:$0xff] %vm779_vm11, %v775_v14 }
 0x1dd   : > { %v993_v15 = vpop.f32.mrb[2].mxu0 }
 0x1de   : > { %v999_v16 = vpop.f32.mrb[2].mxu1  ;;  %v748_v17 = vadd.f32 %v993_v15, %v952_v2  ;;  %v742_v19 = vpop.f32.mrb[3].mxu0 }
 0x1df   : > { %v768_v18 = vadd.f32 %v999_v16, %v952_v2  ;;  %v762_v20 = vpop.f32.mrb[3].mxu1  ;;  %v743_v21 = vadd.f32 %v952_v2, %v742_v19 }
 0x1e0   : > { %v763_v22 = vadd.f32 %v952_v2, %v762_v20  ;;  %v774_v23 = vmax.f32 %v748_v17, 0.0 }
 0x1e1   : > { %v778_v24 = vmax.f32 %v768_v18, 0.0  ;;  %v773_v25 = vmax.f32 %v743_v21, 0.0 }
 0x1e2   : > { %v777_v26 = vmax.f32 %v763_v22, 0.0  ;;  %783 = vst.msk [vmem:[%s192_s20 + $0x18] sm:$0xff] %vm779_vm11, %v774_v23 }
 0x1e3   : > { %787 = vst.msk [vmem:[%s192_s20 + $0x38] sm:$0xff] %vm779_vm11, %v778_v24  ;;  %782 = vst.msk [vmem:[%s192_s20 + $0x10] sm:$0xff] %vm779_vm11, %v773_v25 }
 0x1e4   : > { %786 = vst.msk [vmem:[%s192_s20 + $0x30] sm:$0xff] %vm779_vm11, %v777_v26 }
 0x1e5 PF: > { %s13_s14 = sadd.s32 1, %s1069_s14   ;;  %s1431_s12 = smov %s1065_s13 }
 0x1e6   : > { %p10_p5 = scmp.ge.s32.totalorder %s13_s14, 4   ;;  %s1432_s13 = smov %s1434_s15 }
 0x1e8   :  { %12 = sbr.rel (!%p10_p5) target bundleno = 2 (0x2), region = 68 }

</bundles_post_ra>
